<compile_context>
chip_gen: v7x
topology: tpu7x:2x2x1
jax: 0.10.0
libtpu: 0.0.40
codegen_flags: <defaults>
</compile_context>

<pallas_src>
import functools

import jax
import jax.numpy as jnp
from jax import lax
from jax.experimental import pallas as pl
from jax.experimental.pallas import tpu as pltpu


# ----------------------------------------------------------------------------
# small in-kernel helpers
# ----------------------------------------------------------------------------
_LN_EPS = 1e-5  # nn.LayerNorm default


def _layernorm(x, g, b):
    mu = jnp.mean(x, axis=-1, keepdims=True)
    var = jnp.mean((x - mu) ** 2, axis=-1, keepdims=True)
    return (x - mu) * jax.lax.rsqrt(var + _LN_EPS) * g + b


def _gelu_tanh(x):
    c = 0.7978845608028654  # sqrt(2/pi)
    return 0.5 * x * (1.0 + jnp.tanh(c * (x + 0.044715 * x * x * x)))


def _vmem_capacity_bytes():
    try:
        return int(pltpu.get_tpu_info().vmem_capacity_bytes)
    except Exception:
        return 64 << 20  # conservative: v7x per-TensorCore VMEM


# ----------------------------------------------------------------------------
# kernel 1: patch-embed matmul  (im2col'd bf16 patches @ W + b), tiled on rows
# ----------------------------------------------------------------------------
def _patch_embed_kernel(x_ref, w_ref, b_ref, o_ref):
    o_ref[...] = (
        jnp.dot(x_ref[...], w_ref[...], preferred_element_type=jnp.float32)
        + b_ref[...]
    )


def patch_embed_matmul(x_patches_bf16, w, b, *, single_buffer_weights=True):
    M, K = x_patches_bf16.shape
    D = w.shape[1]
    tm = min(512, M)                     # 512-row tiles ~85% of HBM roofline
    grid = (pl.cdiv(M, tm),)
    wkw = {"pipeline_mode": pl.Buffered(1)} if single_buffer_weights else {}
    return pl.pallas_call(
        _patch_embed_kernel,
        out_shape=jax.ShapeDtypeStruct((M, D), jnp.float32),
        grid=grid,
        in_specs=[
            pl.BlockSpec((tm, K), lambda i: (i, 0)),
            pl.BlockSpec((K, D), lambda i: (0, 0), **wkw),
            pl.BlockSpec((1, D), lambda i: (0, 0), **wkw),
        ],
        out_specs=pl.BlockSpec((tm, D), lambda i: (i, 0)),   # lane-dense (full D)
        compiler_params=pltpu.CompilerParams(
            dimension_semantics=("parallel",)),
    )(x_patches_bf16, w, b.reshape(1, D))


# ----------------------------------------------------------------------------
# kernel 2: one full transformer block (per batch element)
#   x_ref block: (1, S, D) f32; weights passed whole (bf16 matrices, f32 vecs).
# ----------------------------------------------------------------------------
def _block_kernel(num_heads, x_ref, ln1g, ln1b, wq, wk, wv, wp,
                  ln2g, ln2b, w1, b1, w2, b2, o_ref):
    x = x_ref[0]                                   # (S, D) f32
    S, D = x.shape
    hd = D // num_heads

    # --- attention (AttentionWithEinsum; scale pre-folded into wq) ---
    xn = _layernorm(x, ln1g[...], ln1b[...]).astype(jnp.bfloat16)
    # bf16 operands into every MXU matmul, f32 accumulation.
    q = jnp.dot(xn, wq[...], preferred_element_type=jnp.float32).astype(jnp.bfloat16)
    k = jnp.dot(xn, wk[...], preferred_element_type=jnp.float32).astype(jnp.bfloat16)
    v = jnp.dot(xn, wv[...], preferred_element_type=jnp.float32).astype(jnp.bfloat16)

    # Batched per-head attention: (H, S, hd) with H as the dot_general batch
    # dim — one QK^T and one PV matmul instead of H narrow-K matmuls, and no
    # 64-lane masked sub-stores.
    qh = jnp.swapaxes(q.reshape(S, num_heads, hd), 0, 1)     # (H, S, hd) bf16
    kh = jnp.swapaxes(k.reshape(S, num_heads, hd), 0, 1)
    vh = jnp.swapaxes(v.reshape(S, num_heads, hd), 0, 1)

    s = lax.dot_general(qh, kh, (((2,), (2,)), ((0,), (0,))),
                        preferred_element_type=jnp.float32)   # (H, S, S) f32
    s = s - jnp.max(s, axis=-1, keepdims=True)
    e = jnp.exp(s)
    p = e * pl.reciprocal(jnp.sum(e, axis=-1, keepdims=True), approx=True)
    pv = lax.dot_general(p.astype(jnp.bfloat16), vh,
                         (((2,), (1,)), ((0,), (0,))),
                         preferred_element_type=jnp.float32)  # (H, S, hd) f32

    # Head-major (S, D) so the output projection is ONE full-K matmul.
    attn = jnp.swapaxes(pv, 0, 1).reshape(S, D).astype(jnp.bfloat16)
    x = x + jnp.dot(attn, wp[...], preferred_element_type=jnp.float32)

    # --- MLP ---
    xn2 = _layernorm(x, ln2g[...], ln2b[...]).astype(jnp.bfloat16)
    h1 = jnp.dot(xn2, w1[...], preferred_element_type=jnp.float32) + b1[...]
    h1 = _gelu_tanh(h1)
    h2 = jnp.dot(h1.astype(jnp.bfloat16), w2[...],
                 preferred_element_type=jnp.float32) + b2[...]
    o_ref[0] = x + h2


def _block_vmem_limit_bytes(S, D, H, single_buffer_weights):
    """Budget VMEM from the resident footprint, clamped to the chip's VMEM."""
    wbuf = 1 if single_buffer_weights else 2
    mlp = 4 * D
    weight_bytes = (4 * D * D + 2 * D * mlp) * 2 * wbuf      # bf16 weight mats
    io_bytes = 2 * 2 * S * D * 4                             # (1,S,D) in+out, 2-deep
    act_bytes = (6 * S * D + 2 * H * S * S + S * mlp) * 4    # xn/q/k/v/pv, scores, h1
    est = int(1.5 * (weight_bytes + io_bytes + act_bytes)) + (2 << 20)
    cap = _vmem_capacity_bytes()
    return max(16 << 20, min(est, int(0.8 * cap)))


def transformer_block(x, p, num_heads, *, single_buffer_weights=True):
    B, S, D = x.shape
    weights = [p["ln1_g"], p["ln1_b"], p["wq"], p["wk"], p["wv"], p["wp"],
               p["ln2_g"], p["ln2_b"], p["w1"], p["b1"], p["w2"], p["b2"]]
    in_specs = [pl.BlockSpec((1, S, D), lambda b: (b, 0, 0))]
    for w in weights:
        kw = {}
        if single_buffer_weights:
            # constant index map -> weights never change across the grid, so a
            # single buffer suffices (halves weight VMEM; key for v7x 64 MiB).
            kw["pipeline_mode"] = pl.Buffered(1)
        in_specs.append(
            pl.BlockSpec(w.shape, lambda b, _nd=w.ndim: (0,) * _nd, **kw))
    # TODO(synk): add a second parallel grid axis over query-row tiles
    # (flash-style, full K/V per tile) so both v7x TensorCores get work when B
    # is small; and for D>=1280 split attention/MLP into two pallas_calls so
    # resident weights fit v7x's 64 MiB VMEM.
    return pl.pallas_call(
        functools.partial(_block_kernel, num_heads),
        out_shape=jax.ShapeDtypeStruct((B, S, D), jnp.float32),
        grid=(B,),
        in_specs=in_specs,
        out_specs=pl.BlockSpec((1, S, D), lambda b: (b, 0, 0)),
        compiler_params=pltpu.CompilerParams(
            dimension_semantics=("parallel",),
            vmem_limit_bytes=_block_vmem_limit_bytes(
                S, D, num_heads, single_buffer_weights)),
    )(x, *weights)


# ----------------------------------------------------------------------------
# kernel 3: final LayerNorm + classifier head on the CLS token ONLY (B, D)
#   head weight/bias are padded to a 128-lane multiple; slice back in glue.
# ----------------------------------------------------------------------------
def _head_kernel(x_ref, g_ref, b_ref, wh_ref, bh_ref, o_ref):
    xn = _layernorm(x_ref[...], g_ref[...], b_ref[...])     # (B, D) f32
    o_ref[...] = (
        jnp.dot(xn.astype(jnp.bfloat16), wh_ref[...],
                preferred_element_type=jnp.float32)
        + bh_ref[...]
    )


def norm_and_head(cls_tok, g, b, wh, bh):
    B, _ = cls_tok.shape
    Cp = wh.shape[1]
    return pl.pallas_call(
        _head_kernel,
        out_shape=jax.ShapeDtypeStruct((B, Cp), jnp.float32),
    )(cls_tok, g, b, wh, bh.reshape(1, Cp))


# ----------------------------------------------------------------------------
# glue: patch extraction (== strided Conv2d im2col), parameter init, forward
# ----------------------------------------------------------------------------
def extract_patches(x, patch):
    # x: (B, 3, H, W) NCHW -> (B, num_patches, 3*patch*patch), ordering (C,kh,kw)
    B, C, H, W = x.shape
    gh, gw = H // patch, W // patch
    x = x.reshape(B, C, gh, patch, gw, patch)
    x = x.transpose(0, 2, 4, 1, 3, 5)               # (B, gh, gw, C, ph, pw)
    return x.reshape(B, gh * gw, C * patch * patch)


def init_params(key, *, image_size, patch, hidden, layers, heads, classes):
    num_patches = (image_size // patch) ** 2
    mlp = int(4.0 * hidden)
    K = 3 * patch * patch
    head_dim = hidden // heads
    scale = float(head_dim) ** -0.5
    classes_padded = ((classes + 127) // 128) * 128   # lane-dense head output
    keys = iter(jax.random.split(key, 8 + 12 * layers))

    def nrm(shape, std=0.02):
        return jax.random.normal(next(keys), shape, jnp.float32) * std

    head_w = nrm((hidden, classes), std=0.05)
    head_w = jnp.pad(head_w, ((0, 0), (0, classes_padded - classes)))

    params = {
        # Conv2d weight (D, 3, p, p) flattened to (K, D) matmul form, bf16
        "patch_w": nrm((K, hidden), std=0.05).astype(jnp.bfloat16),
        "patch_b": jnp.zeros((hidden,), jnp.float32),
        "cls_token": nrm((1, 1, hidden)),
        "pos_embed": nrm((1, num_patches + 1, hidden)),
        "norm_g": jnp.ones((1, hidden), jnp.float32),
        "norm_b": jnp.zeros((1, hidden), jnp.float32),
        "head_w": head_w.astype(jnp.bfloat16),               # (D, Cp) bf16
        "head_b": jnp.zeros((classes_padded,), jnp.float32),
        "num_classes": classes,
        "blocks": [],
    }
    bound = hidden ** -0.5

    def unif(shape):
        return jax.random.uniform(next(keys), shape, jnp.float32, -bound, bound)

    for _ in range(layers):
        blk = {
            "ln1_g": jnp.ones((1, hidden), jnp.float32),
            "ln1_b": jnp.zeros((1, hidden), jnp.float32),
            # einsum params (D, H, hd)/(H, hd, D) pre-reshaped to (D, D);
            # attention scale folded into wq; stored bf16 for the MXU.
            "wq": (unif((hidden, hidden)) * scale).astype(jnp.bfloat16),
            "wk": unif((hidden, hidden)).astype(jnp.bfloat16),
            "wv": unif((hidden, hidden)).astype(jnp.bfloat16),
            "wp": unif((hidden, hidden)).astype(jnp.bfloat16),
            "ln2_g": jnp.ones((1, hidden), jnp.float32),
            "ln2_b": jnp.zeros((1, hidden), jnp.float32),
            "w1": nrm((hidden, mlp), std=0.05).astype(jnp.bfloat16),
            "b1": jnp.zeros((1, mlp), jnp.float32),
            "w2": nrm((mlp, hidden), std=0.05).astype(jnp.bfloat16),
            "b2": jnp.zeros((1, hidden), jnp.float32),
        }
        params["blocks"].append(blk)
    return params


def vit_forward(x, params, *, patch, heads, single_buffer_weights=True):
    B = x.shape[0]
    D = params["patch_w"].shape[1]
    # patch embed (Conv2d stride=patch) as im2col + tiled Pallas matmul.
    # Cast patches to bf16 in glue: halves the dominant HBM read.
    patches = extract_patches(x, patch).astype(jnp.bfloat16)  # (B, P, K)
    P = patches.shape[1]
    emb = patch_embed_matmul(patches.reshape(B * P, -1),
                             params["patch_w"], params["patch_b"],
                             single_buffer_weights=single_buffer_weights)
    emb = emb.reshape(B, P, D)
    # cls token + positional embedding (glue)
    cls = jnp.broadcast_to(params["cls_token"], (B, 1, D))
    tok = jnp.concatenate([cls, emb], axis=1) + params["pos_embed"]
    # encoder blocks
    for blk in params["blocks"]:
        tok = transformer_block(tok, blk, heads,
                                single_buffer_weights=single_buffer_weights)
    # final norm + head on CLS token only (slice BEFORE the LayerNorm kernel)
    cls_tok = tok[:, 0, :]                                    # (B, D)
    logits = norm_and_head(cls_tok, params["norm_g"], params["norm_b"],
                           params["head_w"], params["head_b"])
    return logits[:, :params["num_classes"]]                  # unpad classes


# ----------------------------------------------------------------------------
# pure-JAX reference (same bf16-in / f32-accumulate math) for correctness
# ----------------------------------------------------------------------------
def _ref_block(x, p, heads):
    B, S, D = x.shape
    hd = D // heads
    xn = _layernorm(x, p["ln1_g"], p["ln1_b"]).astype(jnp.bfloat16)
    q = jnp.dot(xn, p["wq"], preferred_element_type=jnp.float32).astype(jnp.bfloat16)
    k = jnp.dot(xn, p["wk"], preferred_element_type=jnp.float32).astype(jnp.bfloat16)
    v = jnp.dot(xn, p["wv"], preferred_element_type=jnp.float32).astype(jnp.bfloat16)
    qh = q.reshape(B, S, heads, hd)
    kh = k.reshape(B, S, heads, hd)
    vh = v.reshape(B, S, heads, hd)
    s = jnp.einsum("bshd,bthd->bhst", qh, kh,
                   preferred_element_type=jnp.float32)
    attn = jax.nn.softmax(s, axis=-1)
    o = jnp.einsum("bhst,bthd->bshd", attn.astype(jnp.bfloat16), vh,
                   preferred_element_type=jnp.float32).reshape(B, S, D)
    x = x + jnp.dot(o.astype(jnp.bfloat16), p["wp"],
                    preferred_element_type=jnp.float32)
    xn2 = _layernorm(x, p["ln2_g"], p["ln2_b"]).astype(jnp.bfloat16)
    h1 = _gelu_tanh(jnp.dot(xn2, p["w1"],
                            preferred_element_type=jnp.float32) + p["b1"])
    return x + jnp.dot(h1.astype(jnp.bfloat16), p["w2"],
                       preferred_element_type=jnp.float32) + p["b2"]


def ref_forward(x, params, *, patch, heads):
    B = x.shape[0]
    D = params["patch_w"].shape[1]
    patches = extract_patches(x, patch).astype(jnp.bfloat16)
    emb = jnp.dot(patches, params["patch_w"],
                  preferred_element_type=jnp.float32) + params["patch_b"]
    cls = jnp.broadcast_to(params["cls_token"], (B, 1, D))
    tok = jnp.concatenate([cls, emb], axis=1) + params["pos_embed"]
    for blk in params["blocks"]:
        tok = _ref_block(tok, blk, heads)
    cls_n = _layernorm(tok[:, 0], params["norm_g"], params["norm_b"])
    logits = jnp.dot(cls_n.astype(jnp.bfloat16), params["head_w"],
                     preferred_element_type=jnp.float32) + params["head_b"]
    return logits[:, :params["num_classes"]]


# ----------------------------------------------------------------------------
if __name__ == "__main__":
    # small ViT: image 16x16, patch 4 -> 16 patches (+1 cls = 17 tokens),
    # hidden 256, 2 heads (head_dim 128, lane-aligned), 2 layers, 10 classes,
    # batch 2.
    IMAGE, PATCH, HIDDEN, LAYERS, HEADS, CLASSES, BATCH = 16, 4, 256, 2, 2, 10, 2

    key = jax.random.PRNGKey(0)
    pkey, xkey = jax.random.split(key)
    params = init_params(pkey, image_size=IMAGE, patch=PATCH, hidden=HIDDEN,
                         layers=LAYERS, heads=HEADS, classes=CLASSES)
    x = jax.random.normal(xkey, (BATCH, 3, IMAGE, IMAGE), jnp.float32)  # NCHW

    ref = jax.block_until_ready(ref_forward(x, params, patch=PATCH, heads=HEADS))

    def _run_and_check(single_buffer_weights):
        out = jax.block_until_ready(
            vit_forward(x, params, patch=PATCH, heads=HEADS,
                        single_buffer_weights=single_buffer_weights))
        ok = bool(jnp.allclose(out, ref, atol=1e-2, rtol=1e-2))
        return out, ok

    # Prefer single-buffered (pl.Buffered(1)) weight specs; fall back to the
    # default double-buffered pipeline if this JAX/Mosaic build rejects it.
    out, ok = None, False
    try:
        out, ok = _run_and_check(True)
    except Exception:
        out, ok = None, False
    if not ok:
        out, ok = _run_and_check(False)

    assert out.shape == (BATCH, CLASSES), out.shape
    assert ok, float(jnp.max(jnp.abs(out - ref)))
    print("KERNEL_OK")
</pallas_src>

<mosaic_0001>
module attributes {stable_mosaic.version = 11 : i64} {
  func.func @_patch_embed_kernel(%arg0: i32, %arg1: memref<32x48xbf16, #tpu.memory_space<vmem>>, %arg2: memref<48x256xbf16, #tpu.memory_space<vmem>>, %arg3: memref<1x256xf32, #tpu.memory_space<vmem>>, %arg4: memref<32x256xf32, #tpu.memory_space<vmem>>) attributes {dimension_semantics = [#tpu.dimension_semantics<parallel>], iteration_bounds = array<i64: 1>, scalar_prefetch = 0 : i64, scratch_operands = 0 : i64, tpu.core_type = #tpu.core_type<tc>, window_params = [{transform_indices = @transform_0, window_bounds = array<i64: 32, 48>}, {pipeline_mode = #tpu.pipeline_mode<synchronous>, transform_indices = @transform_1, window_bounds = array<i64: 48, 256>}, {pipeline_mode = #tpu.pipeline_mode<synchronous>, transform_indices = @transform_2, window_bounds = array<i64: 1, 256>}, {transform_indices = @transform_3, window_bounds = array<i64: 32, 256>}]} {
    %c0 = arith.constant 0 : index
    %c0_0 = arith.constant 0 : index
    %0 = vector.load %arg1[%c0, %c0_0] : memref<32x48xbf16, #tpu.memory_space<vmem>>, vector<32x48xbf16>
    %c0_1 = arith.constant 0 : index
    %c0_2 = arith.constant 0 : index
    %1 = vector.load %arg2[%c0_1, %c0_2] : memref<48x256xbf16, #tpu.memory_space<vmem>>, vector<48x256xbf16>
    %cst = arith.constant dense<0.000000e+00> : vector<32x256xf32>
    %2 = tpu.matmul %0, %1, %cst {dimension_numbers = #tpu.dot_dimension_numbers<[1], [0], [0], [1], [0, 0, 1, 1], [], []>} : vector<32x48xbf16>, vector<48x256xbf16>, vector<32x256xf32> -> vector<32x256xf32>
    %c0_3 = arith.constant 0 : index
    %c0_4 = arith.constant 0 : index
    %3 = vector.load %arg3[%c0_3, %c0_4] : memref<1x256xf32, #tpu.memory_space<vmem>>, vector<1x256xf32>
    %4 = vector.broadcast %3 : vector<1x256xf32> to vector<32x256xf32>
    %5 = arith.addf %2, %4 : vector<32x256xf32>
    %c0_5 = arith.constant 0 : index
    %c0_6 = arith.constant 0 : index
    %6 = vector.load %arg4[%c0_5, %c0_6] : memref<32x256xf32, #tpu.memory_space<vmem>>, vector<32x256xf32>
    tpu.vector_store %arg4[%c0_5, %c0_6], %5 {strides = array<i32>} : memref<32x256xf32, #tpu.memory_space<vmem>>, vector<32x256xf32>,
    return
  }
  func.func @transform_0(%arg0: i32) -> (i32, i32) {
    %c0_i32 = arith.constant 0 : i32
    %c0_i32_0 = arith.constant 0 : i32
    return %arg0, %c0_i32 : i32, i32
  }
  func.func @transform_1(%arg0: i32) -> (i32, i32) {
    %c0_i32 = arith.constant 0 : i32
    %c0_i32_0 = arith.constant 0 : i32
    %c0_i32_1 = arith.constant 0 : i32
    return %c0_i32, %c0_i32_0 : i32, i32
  }
  func.func @transform_2(%arg0: i32) -> (i32, i32) {
    %c0_i32 = arith.constant 0 : i32
    %c0_i32_0 = arith.constant 0 : i32
    %c0_i32_1 = arith.constant 0 : i32
    return %c0_i32, %c0_i32_0 : i32, i32
  }
  func.func @transform_3(%arg0: i32) -> (i32, i32) {
    %c0_i32 = arith.constant 0 : i32
    %c0_i32_0 = arith.constant 0 : i32
    return %arg0, %c0_i32 : i32, i32
  }
}

module attributes {stable_mosaic.version = 11 : i64} {
  func.func @_patch_embed_kernel(%arg0: i32, %arg1: memref<32x48xbf16, #tpu.memory_space<vmem>>, %arg2: memref<48x256xbf16, #tpu.memory_space<vmem>>, %arg3: memref<1x256xf32, #tpu.memory_space<vmem>>, %arg4: memref<32x256xf32, #tpu.memory_space<vmem>>) attributes {dimension_semantics = [#tpu.dimension_semantics<parallel>], iteration_bounds = array<i64: 1>, scalar_prefetch = 0 : i64, scratch_operands = 0 : i64, tpu.core_type = #tpu.core_type<tc>, window_params = [{transform_indices = @transform_0, window_bounds = array<i64: 32, 48>}, {pipeline_mode = #tpu.pipeline_mode<synchronous>, transform_indices = @transform_1, window_bounds = array<i64: 48, 256>}, {pipeline_mode = #tpu.pipeline_mode<synchronous>, transform_indices = @transform_2, window_bounds = array<i64: 1, 256>}, {transform_indices = @transform_3, window_bounds = array<i64: 32, 256>}]} {
    %c0 = arith.constant 0 : index
    %c0_0 = arith.constant 0 : index
    %0 = vector.load %arg1[%c0, %c0_0] : memref<32x48xbf16, #tpu.memory_space<vmem>>, vector<32x48xbf16>
    %c0_1 = arith.constant 0 : index
    %c0_2 = arith.constant 0 : index
    %1 = vector.load %arg2[%c0_1, %c0_2] : memref<48x256xbf16, #tpu.memory_space<vmem>>, vector<48x256xbf16>
    %cst = arith.constant dense<0.000000e+00> : vector<32x256xf32>
    %2 = tpu.matmul %0, %1, %cst {dimension_numbers = #tpu.dot_dimension_numbers<[1], [0], [0], [1], [0, 0, 1, 1], [], []>} : vector<32x48xbf16>, vector<48x256xbf16>, vector<32x256xf32> -> vector<32x256xf32>
    %c0_3 = arith.constant 0 : index
    %c0_4 = arith.constant 0 : index
    %3 = vector.load %arg3[%c0_3, %c0_4] : memref<1x256xf32, #tpu.memory_space<vmem>>, vector<1x256xf32>
    %4 = vector.broadcast %3 : vector<1x256xf32> to vector<32x256xf32>
    %5 = arith.addf %2, %4 : vector<32x256xf32>
    %c0_5 = arith.constant 0 : index
    %c0_6 = arith.constant 0 : index
    %6 = vector.load %arg4[%c0_5, %c0_6] : memref<32x256xf32, #tpu.memory_space<vmem>>, vector<32x256xf32>
    tpu.vector_store %arg4[%c0_5, %c0_6], %5 {strides = array<i32>} : memref<32x256xf32, #tpu.memory_space<vmem>>, vector<32x256xf32>,
    return
  }
  func.func @transform_0(%arg0: i32) -> (i32, i32) {
    %c0_i32 = arith.constant 0 : i32
    %c0_i32_0 = arith.constant 0 : i32
    return %arg0, %c0_i32 : i32, i32
  }
  func.func @transform_1(%arg0: i32) -> (i32, i32) {
    %c0_i32 = arith.constant 0 : i32
    %c0_i32_0 = arith.constant 0 : i32
    %c0_i32_1 = arith.constant 0 : i32
    return %c0_i32, %c0_i32_0 : i32, i32
  }
  func.func @transform_2(%arg0: i32) -> (i32, i32) {
    %c0_i32 = arith.constant 0 : i32
    %c0_i32_0 = arith.constant 0 : i32
    %c0_i32_1 = arith.constant 0 : i32
    return %c0_i32, %c0_i32_0 : i32, i32
  }
  func.func @transform_3(%arg0: i32) -> (i32, i32) {
    %c0_i32 = arith.constant 0 : i32
    %c0_i32_0 = arith.constant 0 : i32
    return %arg0, %c0_i32 : i32, i32
  }
}

</mosaic_0001>

<bundles_post_ra>
// kernel: tpu_custom_call.1
= control target key start
LH: loop header
LB: loop body
LE: loop exit
PB: predicated region body
PF: predicated region fallthrough
CT: control target
= control target key end

     0   :  { %8 = vsyncpa [#allocation3], 0  ;;  %s370_s0 = inlined_call_operand.hbm [shape: bf16[32,48], index: 0, kind: input, shape index: {}]   ;;  %s371_s1 = inlined_call_operand.hbm [shape: bf16[48,256], index: 1, kind: input, shape index: {}]   ;;  %s372_s2 = inlined_call_operand.vmem [shape: f32[1,256], index: 2, kind: input, shape index: {}]   ;;  %s373_s3 = inlined_call_operand.hbm [shape: f32[32,256], index: 3, kind: output, shape index: {}]  }
   0x1   :  { %9 = vsyncpa [#allocation6], 0 }
   0x2   :  { %10 = vsyncpa [#allocation4], 0  ;;  %s301_s12 = smov [#allocation2]   ;;  %s229_s16 = scalar_lea.hbm %s370_s0, 256 }
   0x3   :  { %s16_s13 = sshll.u32 %s301_s12, 4  ;;  %p230_p0 = scmp.ne.s32.totalorder %s370_s0, %s229_s16  ;;  %s17_s13 = int_to_ptr.vmem [resolvable:$true] %s16_s13 }
   0x4   :  { %p233_p1 = scmp.lt.u32.totalorder %s229_s16, %s370_s0 }
   0x6   :  { %p235_p2 = pnand %p233_p1, %p230_p0 }
   0x8   :  { %238 = shalt.err (!%p235_p2)
}
   0x9   :  { %s239_s21 = scalar_lea.vmem %s17_s13, 256  ;;  %p244_p4 = scmp.lt.s32.totalorder %s17_s13, %s17_s13 }
   0xa   :  { %p240_p3 = scmp.ne.s32.totalorder %s17_s13, %s239_s21  ;;  %p245_p5 = scmp.lt.s32.totalorder %s239_s21, %s239_s21 }
   0xc   :  { %p246_p6 = por %p245_p5, %p244_p4 }
   0xe   :  { %p247_p7 = pnand %p246_p6, %p240_p3 }
  0x10   :  { %250 = shalt.err (!%p247_p7)
}
  0x11   :  { %s302_s22 = smov 64   ;;  %s303_s23 = smov 4  }
  0x12   :  { %22 = dma.hbm_to_vmem [thread:$0]  %s370_s0, 256, %s17_s13, [#allocation3], %s302_s22, %s302_s22, %s303_s23  }
  0x13   :  { %s304_s26 = smov [#allocation5]   ;;  %s251_s30 = scalar_lea.hbm %s371_s1, 768 }
  0x14   :  { %s28_s27 = sshll.u32 %s304_s26, 4  ;;  %p252_p8 = scmp.ne.s32.totalorder %s371_s1, %s251_s30  ;;  %s29_s27 = int_to_ptr.vmem [resolvable:$true] %s28_s27 }
  0x15   :  { %p255_p9 = scmp.lt.u32.totalorder %s251_s30, %s371_s1 }
  0x17   :  { %p257_p10 = pnand %p255_p9, %p252_p8 }
  0x19   :  { %260 = shalt.err (!%p257_p10)
}
  0x1a   :  { %s261_s8 = scalar_lea.vmem %s29_s27, 768  ;;  %p266_p12 = scmp.lt.s32.totalorder %s29_s27, %s29_s27 }
  0x1b   :  { %p262_p11 = scmp.ne.s32.totalorder %s29_s27, %s261_s8  ;;  %p267_p13 = scmp.lt.s32.totalorder %s261_s8, %s261_s8 }
  0x1d   :  { %p268_p0 = por %p267_p13, %p266_p12 }
  0x1f   :  { %p269_p1 = pnand %p268_p0, %p262_p11 }
  0x21   :  { %272 = shalt.err (!%p269_p1)
}
  0x22   :  { %s305_s0 = smov 128   ;;  %s306_s9 = smov 8  }
  0x23   :  { %34 = dma.hbm_to_vmem [thread:$0]  %s371_s1, 768, %s29_s27, [#allocation6], %s305_s0, %s305_s0, %s306_s9  }
  0x24   :  { %295 = dma.done.wait [#allocation3], 256  }
  0x25   :  { %296 = vsyncadd [#allocation3], 4294967040 }
  0x26   :  { %297 = dma.done.wait [#allocation6], 768  }
  0x27   :  { %298 = vsyncadd [#allocation6], 4294966528  ;;  %v307_v0 = vmov 0   ;;  %v218_v1 = vld [vmem:[#allocation5 + $0x4] ss:$8 sps:$4 sm:$0xff]   ;;  %v227_v7 = vld [vmem:[#allocation2] sm:$0xff]   ;;  %v56_v9 = vlaneseq }
  0x28   :  { %145 = vmatprep.mubr.bf16.mxu0 %v307_v0  ;;  %155 = vmatprep.mubr.bf16.mxu1 %v307_v0  ;;  %v220_v2 = vld [vmem:[#allocation5] ss:$8 sps:$4 sm:$0xff]   ;;  %v221_v3 = vld [vmem:[#allocation5 + $0x14] ss:$8 sps:$4 sm:$0xff]   ;;  %v223_v4 = vld [vmem:[#allocation5 + $0x10] ss:$8 sps:$4 sm:$0xff]  }
  0x29   :  { %113 = vmatprep.subr.bf16.mxu0 %v218_v1  ;;  %202 = vmatprep.subr.bf16.mxu1 %v218_v1  ;;  %v224_v5 = vld [vmem:[#allocation5 + $0x24] ss:$8 sps:$4 sm:$0xff]   ;;  %v226_v6 = vld [vmem:[#allocation5 + $0x20] ss:$8 sps:$4 sm:$0xff]   ;;  %v228_v8 = vld [vmem:[#allocation2 + $0x8] sm:$0xff]   ;;  %vm106_vm0 = vcmask 392192  }
  0x2a   :  { %114 = vmatpush1.bf16.msra.mxu0 %v220_v2  ;;  %205 = vmatpush1.bf16.msra.mxu1 %v220_v2  ;;  %v57_v10 = vshrl.u32 %v56_v9, 7  ;;  %v54_v12 = vld [vmem:[%s372_s2] sm:$0x3]  ;;  %s308_s13 = smov [#allocation7]  }
  0x2b   :  { %115 = vmatprep.subr.bf16.mxu0 %v221_v3  ;;  %203 = vmatprep.subr.bf16.mxu1 %v221_v3  ;;  %s179_s14 = sshll.u32 %s308_s13, 4  ;;  %s180_s14 = int_to_ptr.vmem [resolvable:$true] %s179_s14 }
  0x2c   :  { %v58_v11 = vsub.s32 0, %v57_v10  ;;  %v62_v13 = vsub.s32 1, %v57_v10  ;;  %s273_s2 = scalar_lea.vmem %s180_s14, 1024  ;;  %p278_p3 = scmp.lt.s32.totalorder %s180_s14, %s180_s14 }
  0x2d   :  { %p274_p2 = scmp.ne.s32.totalorder %s180_s14, %s273_s2  ;;  %p279_p4 = scmp.lt.s32.totalorder %s273_s2, %s273_s2 }
  0x2e   :  { %116 = vmatpush1.bf16.msra.mxu0 %v223_v4  ;;  %206 = vmatpush1.bf16.msra.mxu1 %v223_v4  ;;  %v59_v14 = vrot.slane %v54_v12, %v58_v11  ;;  %v63_v15 = vrot.slane %v54_v12, %v62_v13 }
  0x2f   :  { %117 = vmatprep.subr.bf16.mxu0 %v224_v5  ;;  %204 = vmatprep.subr.bf16.mxu1 %v224_v5  ;;  %p280_p5 = por %p279_p4, %p278_p3 }
  0x31   :  { %p281_p6 = pnand %p280_p5, %p274_p2 }
  0x32   :  { %118 = vmatpush1.bf16.msra.mxu0 %v226_v6  ;;  %207 = vmatpush1.bf16.msra.mxu1 %v226_v6 }
  0x35   :  { %200 = vmatmul.mubr.msk.bf16.vlgmr.msra.gmra.mrb[0].mxu0 %vm106_vm0, %v227_v7  ;;  %201 = vmatmul.mubr.msk.bf16.vlgmr.msra.gmra.mrb[0].mxu1 %vm106_vm0, %v228_v8 }
 0x108   :  { %v147_v16 = vpop.f32.mrb[0].mxu0  ;;  %v157_v17 = vpop.f32.mrb[0].mxu1 }
 0x109   :  { %v148_v18 = vadd.f32 %v147_v16, %v59_v14  ;;  %v158_v19 = vadd.f32 %v157_v17, %v59_v14  ;;  %v149_v20 = vpop.f32.mrb[1].mxu0  ;;  %v159_v21 = vpop.f32.mrb[1].mxu1 }
 0x10a   :  { %v150_v22 = vadd.f32 %v149_v20, %v63_v15  ;;  %v160_v23 = vadd.f32 %v159_v21, %v63_v15  ;;  %v151_v24 = vpop.f32.mrb[2].mxu0  ;;  %v161_v25 = vpop.f32.mrb[2].mxu1 }
 0x10b   :  { %166 = vst [vmem:[#allocation7] sm:$0xff] %v148_v18  ;;  %170 = vst [vmem:[#allocation7 + $0x20] sm:$0xff] %v158_v19  ;;  %v152_v26 = vadd.f32 %v151_v24, %v59_v14  ;;  %v162_v27 = vadd.f32 %v161_v25, %v59_v14  ;;  %v153_v28 = vpop.f32.mrb[3].mxu0  ;;  %v163_v29 = vpop.f32.mrb[3].mxu1 }
 0x10c   :  { %167 = vst [vmem:[#allocation7 + $0x8] sm:$0xff] %v150_v22  ;;  %171 = vst [vmem:[#allocation7 + $0x28] sm:$0xff] %v160_v23  ;;  %v154_v30 = vadd.f32 %v153_v28, %v63_v15  ;;  %v164_v31 = vadd.f32 %v163_v29, %v63_v15 }
 0x10d   :  { %168 = vst [vmem:[#allocation7 + $0x10] sm:$0xff] %v152_v26  ;;  %172 = vst [vmem:[#allocation7 + $0x30] sm:$0xff] %v162_v27 }
 0x10e   :  { %169 = vst [vmem:[#allocation7 + $0x18] sm:$0xff] %v154_v30  ;;  %173 = vst [vmem:[#allocation7 + $0x38] sm:$0xff] %v164_v31 }
 0x10f   :  { %284 = shalt.err (!%p281_p6)
}
 0x110   :  { %s285_s17 = scalar_lea.hbm %s373_s3, 1024 }
 0x111   :  { %p286_p7 = scmp.ne.s32.totalorder %s373_s3, %s285_s17  ;;  %p289_p8 = scmp.lt.u32.totalorder %s285_s17, %s373_s3 }
 0x113   :  { %p291_p9 = pnand %p289_p8, %p286_p7 }
 0x115   :  { %294 = shalt.err (!%p291_p9)
}
 0x116   :  { %s309_s22 = smov 256   ;;  %s310_s23 = smov 16  }
 0x117   :  { %185 = dma.vmem_to_hbm [thread:$0]  %s180_s14, 1024, %s373_s3, [#allocation4], %s309_s22, %s309_s22, %s310_s23  }
 0x118   :  { %299 = dma.done.wait [#allocation4], 1024  }
 0x119   :  { %300 = vsyncadd [#allocation4], 4294966272 }
 0x11a   :  { %189 = vsyncpa [#allocation3], 1 }
 0x11b   :  { %190 = vsyncpa [#allocation6], 1 }
 0x11c   :  { %191 = vsyncpa [#allocation4], 1 }

// kernel: tpu_custom_call.1
= control target key start
LH: loop header
LB: loop body
LE: loop exit
PB: predicated region body
PF: predicated region fallthrough
CT: control target
= control target key end

     0   :  { %8 = vsyncpa [#allocation3], 0  ;;  %s370_s0 = inlined_call_operand.hbm [shape: bf16[32,48], index: 0, kind: input, shape index: {}]   ;;  %s371_s1 = inlined_call_operand.hbm [shape: bf16[48,256], index: 1, kind: input, shape index: {}]   ;;  %s372_s2 = inlined_call_operand.vmem [shape: f32[1,256], index: 2, kind: input, shape index: {}]   ;;  %s373_s3 = inlined_call_operand.hbm [shape: f32[32,256], index: 3, kind: output, shape index: {}]  }
   0x1   :  { %9 = vsyncpa [#allocation6], 0 }
   0x2   :  { %10 = vsyncpa [#allocation4], 0  ;;  %s301_s12 = smov [#allocation2]   ;;  %s229_s16 = scalar_lea.hbm %s370_s0, 256 }
   0x3   :  { %s16_s13 = sshll.u32 %s301_s12, 4  ;;  %p230_p0 = scmp.ne.s32.totalorder %s370_s0, %s229_s16  ;;  %s17_s13 = int_to_ptr.vmem [resolvable:$true] %s16_s13 }
   0x4   :  { %p233_p1 = scmp.lt.u32.totalorder %s229_s16, %s370_s0 }
   0x6   :  { %p235_p2 = pnand %p233_p1, %p230_p0 }
   0x8   :  { %238 = shalt.err (!%p235_p2)
}
   0x9   :  { %s239_s21 = scalar_lea.vmem %s17_s13, 256  ;;  %p244_p4 = scmp.lt.s32.totalorder %s17_s13, %s17_s13 }
   0xa   :  { %p240_p3 = scmp.ne.s32.totalorder %s17_s13, %s239_s21  ;;  %p245_p5 = scmp.lt.s32.totalorder %s239_s21, %s239_s21 }
   0xc   :  { %p246_p6 = por %p245_p5, %p244_p4 }
   0xe   :  { %p247_p7 = pnand %p246_p6, %p240_p3 }
  0x10   :  { %250 = shalt.err (!%p247_p7)
}
  0x11   :  { %s302_s22 = smov 64   ;;  %s303_s23 = smov 4  }
  0x12   :  { %22 = dma.hbm_to_vmem [thread:$0]  %s370_s0, 256, %s17_s13, [#allocation3], %s302_s22, %s302_s22, %s303_s23  }
  0x13   :  { %s304_s26 = smov [#allocation5]   ;;  %s251_s30 = scalar_lea.hbm %s371_s1, 768 }
  0x14   :  { %s28_s27 = sshll.u32 %s304_s26, 4  ;;  %p252_p8 = scmp.ne.s32.totalorder %s371_s1, %s251_s30  ;;  %s29_s27 = int_to_ptr.vmem [resolvable:$true] %s28_s27 }
  0x15   :  { %p255_p9 = scmp.lt.u32.totalorder %s251_s30, %s371_s1 }
  0x17   :  { %p257_p10 = pnand %p255_p9, %p252_p8 }
  0x19   :  { %260 = shalt.err (!%p257_p10)
}
  0x1a   :  { %s261_s8 = scalar_lea.vmem %s29_s27, 768  ;;  %p266_p12 = scmp.lt.s32.totalorder %s29_s27, %s29_s27 }
  0x1b   :  { %p262_p11 = scmp.ne.s32.totalorder %s29_s27, %s261_s8  ;;  %p267_p13 = scmp.lt.s32.totalorder %s261_s8, %s261_s8 }
  0x1d   :  { %p268_p0 = por %p267_p13, %p266_p12 }
  0x1f   :  { %p269_p1 = pnand %p268_p0, %p262_p11 }
  0x21   :  { %272 = shalt.err (!%p269_p1)
}
  0x22   :  { %s305_s0 = smov 128   ;;  %s306_s9 = smov 8  }
  0x23   :  { %34 = dma.hbm_to_vmem [thread:$0]  %s371_s1, 768, %s29_s27, [#allocation6], %s305_s0, %s305_s0, %s306_s9  }
  0x24   :  { %295 = dma.done.wait [#allocation3], 256  }
  0x25   :  { %296 = vsyncadd [#allocation3], 4294967040 }
  0x26   :  { %297 = dma.done.wait [#allocation6], 768  }
  0x27   :  { %298 = vsyncadd [#allocation6], 4294966528  ;;  %v307_v0 = vmov 0   ;;  %v218_v1 = vld [vmem:[#allocation5 + $0x4] ss:$8 sps:$4 sm:$0xff]   ;;  %v227_v7 = vld [vmem:[#allocation2] sm:$0xff]   ;;  %v56_v9 = vlaneseq }
  0x28   :  { %145 = vmatprep.mubr.bf16.mxu0 %v307_v0  ;;  %155 = vmatprep.mubr.bf16.mxu1 %v307_v0  ;;  %v220_v2 = vld [vmem:[#allocation5] ss:$8 sps:$4 sm:$0xff]   ;;  %v221_v3 = vld [vmem:[#allocation5 + $0x14] ss:$8 sps:$4 sm:$0xff]   ;;  %v223_v4 = vld [vmem:[#allocation5 + $0x10] ss:$8 sps:$4 sm:$0xff]  }
  0x29   :  { %113 = vmatprep.subr.bf16.mxu0 %v218_v1  ;;  %202 = vmatprep.subr.bf16.mxu1 %v218_v1  ;;  %v224_v5 = vld [vmem:[#allocation5 + $0x24] ss:$8 sps:$4 sm:$0xff]   ;;  %v226_v6 = vld [vmem:[#allocation5 + $0x20] ss:$8 sps:$4 sm:$0xff]   ;;  %v228_v8 = vld [vmem:[#allocation2 + $0x8] sm:$0xff]   ;;  %vm106_vm0 = vcmask 392192  }
  0x2a   :  { %114 = vmatpush1.bf16.msra.mxu0 %v220_v2  ;;  %205 = vmatpush1.bf16.msra.mxu1 %v220_v2  ;;  %v57_v10 = vshrl.u32 %v56_v9, 7  ;;  %v54_v12 = vld [vmem:[%s372_s2] sm:$0x3]  ;;  %s308_s13 = smov [#allocation7]  }
  0x2b   :  { %115 = vmatprep.subr.bf16.mxu0 %v221_v3  ;;  %203 = vmatprep.subr.bf16.mxu1 %v221_v3  ;;  %s179_s14 = sshll.u32 %s308_s13, 4  ;;  %s180_s14 = int_to_ptr.vmem [resolvable:$true] %s179_s14 }
  0x2c   :  { %v58_v11 = vsub.s32 0, %v57_v10  ;;  %v62_v13 = vsub.s32 1, %v57_v10  ;;  %s273_s2 = scalar_lea.vmem %s180_s14, 1024  ;;  %p278_p3 = scmp.lt.s32.totalorder %s180_s14, %s180_s14 }
  0x2d   :  { %p274_p2 = scmp.ne.s32.totalorder %s180_s14, %s273_s2  ;;  %p279_p4 = scmp.lt.s32.totalorder %s273_s2, %s273_s2 }
  0x2e   :  { %116 = vmatpush1.bf16.msra.mxu0 %v223_v4  ;;  %206 = vmatpush1.bf16.msra.mxu1 %v223_v4  ;;  %v59_v14 = vrot.slane %v54_v12, %v58_v11  ;;  %v63_v15 = vrot.slane %v54_v12, %v62_v13 }
  0x2f   :  { %117 = vmatprep.subr.bf16.mxu0 %v224_v5  ;;  %204 = vmatprep.subr.bf16.mxu1 %v224_v5  ;;  %p280_p5 = por %p279_p4, %p278_p3 }
  0x31   :  { %p281_p6 = pnand %p280_p5, %p274_p2 }
  0x32   :  { %118 = vmatpush1.bf16.msra.mxu0 %v226_v6  ;;  %207 = vmatpush1.bf16.msra.mxu1 %v226_v6 }
  0x35   :  { %200 = vmatmul.mubr.msk.bf16.vlgmr.msra.gmra.mrb[0].mxu0 %vm106_vm0, %v227_v7  ;;  %201 = vmatmul.mubr.msk.bf16.vlgmr.msra.gmra.mrb[0].mxu1 %vm106_vm0, %v228_v8 }
 0x108   :  { %v147_v16 = vpop.f32.mrb[0].mxu0  ;;  %v157_v17 = vpop.f32.mrb[0].mxu1 }
 0x109   :  { %v148_v18 = vadd.f32 %v147_v16, %v59_v14  ;;  %v158_v19 = vadd.f32 %v157_v17, %v59_v14  ;;  %v149_v20 = vpop.f32.mrb[1].mxu0  ;;  %v159_v21 = vpop.f32.mrb[1].mxu1 }
 0x10a   :  { %v150_v22 = vadd.f32 %v149_v20, %v63_v15  ;;  %v160_v23 = vadd.f32 %v159_v21, %v63_v15  ;;  %v151_v24 = vpop.f32.mrb[2].mxu0  ;;  %v161_v25 = vpop.f32.mrb[2].mxu1 }
 0x10b   :  { %166 = vst [vmem:[#allocation7] sm:$0xff] %v148_v18  ;;  %170 = vst [vmem:[#allocation7 + $0x20] sm:$0xff] %v158_v19  ;;  %v152_v26 = vadd.f32 %v151_v24, %v59_v14  ;;  %v162_v27 = vadd.f32 %v161_v25, %v59_v14  ;;  %v153_v28 = vpop.f32.mrb[3].mxu0  ;;  %v163_v29 = vpop.f32.mrb[3].mxu1 }
 0x10c   :  { %167 = vst [vmem:[#allocation7 + $0x8] sm:$0xff] %v150_v22  ;;  %171 = vst [vmem:[#allocation7 + $0x28] sm:$0xff] %v160_v23  ;;  %v154_v30 = vadd.f32 %v153_v28, %v63_v15  ;;  %v164_v31 = vadd.f32 %v163_v29, %v63_v15 }
 0x10d   :  { %168 = vst [vmem:[#allocation7 + $0x10] sm:$0xff] %v152_v26  ;;  %172 = vst [vmem:[#allocation7 + $0x30] sm:$0xff] %v162_v27 }
 0x10e   :  { %169 = vst [vmem:[#allocation7 + $0x18] sm:$0xff] %v154_v30  ;;  %173 = vst [vmem:[#allocation7 + $0x38] sm:$0xff] %v164_v31 }
 0x10f   :  { %284 = shalt.err (!%p281_p6)
}
 0x110   :  { %s285_s17 = scalar_lea.hbm %s373_s3, 1024 }
 0x111   :  { %p286_p7 = scmp.ne.s32.totalorder %s373_s3, %s285_s17  ;;  %p289_p8 = scmp.lt.u32.totalorder %s285_s17, %s373_s3 }
 0x113   :  { %p291_p9 = pnand %p289_p8, %p286_p7 }
 0x115   :  { %294 = shalt.err (!%p291_p9)
}
 0x116   :  { %s309_s22 = smov 256   ;;  %s310_s23 = smov 16  }
 0x117   :  { %185 = dma.vmem_to_hbm [thread:$0]  %s180_s14, 1024, %s373_s3, [#allocation4], %s309_s22, %s309_s22, %s310_s23  }
 0x118   :  { %299 = dma.done.wait [#allocation4], 1024  }
 0x119   :  { %300 = vsyncadd [#allocation4], 4294966272 }
 0x11a   :  { %189 = vsyncpa [#allocation3], 1 }
 0x11b   :  { %190 = vsyncpa [#allocation6], 1 }
 0x11c   :  { %191 = vsyncpa [#allocation4], 1 }

</bundles_post_ra>
